<compile_context>
chip_gen: v5e
topology: v5e:2x2
jax: 0.10.0
libtpu: 0.0.40
codegen_flags: <defaults>
</compile_context>

<pallas_src>
import math
import functools

import numpy as np
import jax
import jax.numpy as jnp
from jax import lax
from jax.experimental import pallas as pl
from jax.experimental.pallas import tpu as pltpu

KSIZES = (1, 3, 5)
MAXPAD = max(KSIZES) // 2            # 2
KW = 2 * MAXPAD + 1                  # 5 packed taps
EPS = 1e-5


# --------------------------------------------------------------------------- #
# Host-side parameter packing (kept out of the traced path).
# --------------------------------------------------------------------------- #
def pack_params(params):
    """Pack per-branch Conv1d weights into one fused (3*Cout, KW*Cin) tap matrix
    plus concatenated biases.  Pure numpy; call once, outside jit."""
    c_out, c_in, _ = np.asarray(params["w"][0]).shape
    c3 = len(KSIZES) * c_out
    w2 = np.zeros((c3, KW * c_in), np.float32)
    for br, k in enumerate(KSIZES):
        w = np.asarray(params["w"][br], np.float32)          # (Cout, Cin, k)
        off = MAXPAD - k // 2
        for j in range(k):
            dk = off + j
            w2[br * c_out:(br + 1) * c_out, dk * c_in:(dk + 1) * c_in] = w[:, :, j]
    b2 = np.concatenate([np.asarray(params["b"][i], np.float32)
                         for i in range(len(KSIZES))]).reshape(c3, 1)
    return {"w2": jnp.asarray(w2), "b2": jnp.asarray(b2),
            "gamma": jnp.asarray(params["gamma"], jnp.float32),
            "beta": jnp.asarray(params["beta"], jnp.float32)}


# --------------------------------------------------------------------------- #
# Kernels
# --------------------------------------------------------------------------- #
def _gelu_exact(x):
    # PyTorch nn.GELU() default is the exact (erf) formulation.
    return 0.5 * x * (1.0 + lax.erf(x * (1.0 / math.sqrt(2.0))))


def _conv_gelu_stats_kernel(xp_ref, w2_ref, b2_ref, y_ref, stats_ref, *,
                            tb, c_in, c3, seq_len, true_b, matmul_dtype,
                            fuse_taps, gelu_approx):
    """Fused 3-branch Conv1d + bias + GELU + per-block BN partial sums.

    xp_ref    : (1, Cin, tb*L)     tb batch rows packed along lanes (f32)
    w2_ref    : (3C, KW*Cin)       fused tap weights (matmul dtype)
    b2_ref    : (3C, 1)            concatenated biases (f32)
    y_ref     : (1, 3C, tb*L)      GELU activations (act dtype), lane-dense
    stats_ref : (1, 2, 3C)         [sum, sum_sq] over this block's valid rows (f32)
    """
    L = seq_len
    lanes = tb * L
    x = xp_ref[0]                                          # (Cin, lanes) f32
    if x.dtype != matmul_dtype:
        x = x.astype(matmul_dtype)

    # Hoisted lane indices (reused by every tap and by the tail mask).
    pos = lax.broadcasted_iota(jnp.int32, (1, lanes), 1)
    pos_in_seq = pos % L

    def shifted(shift):
        # Tap slab: out[:, b*L + t] = x_b[:, t + shift], zero outside [0, L).
        # The circular roll wraps across row/block boundaries only into positions
        # that are zero-masked anyway (conv zero padding).
        if shift == 0:
            return x
        s = pltpu.roll(x, (-shift) % lanes, axis=1)        # XLU rotate (free slot)
        if shift < 0:
            valid = pos_in_seq >= (-shift)
        else:
            valid = pos_in_seq < (L - shift)
        return jnp.where(valid, s, 0)                      # VPU select -> zero pad

    w2 = w2_ref[...]
    if fuse_taps:
        # Small Cin: one matmul with K = KW*Cin, N = tb*L.
        rhs = jnp.concatenate([shifted(dk - MAXPAD) for dk in range(KW)], axis=0)
        acc = jnp.dot(w2, rhs, preferred_element_type=jnp.float32)    # (3C, lanes)
    else:
        # Large Cin: skip the im2col slab, accumulate one matmul per tap.
        acc = jnp.zeros((c3, lanes), jnp.float32)
        for dk in range(KW):
            acc = acc + jnp.dot(w2[:, dk * c_in:(dk + 1) * c_in],
                                shifted(dk - MAXPAD),
                                preferred_element_type=jnp.float32)

    z = acc + b2_ref[...]
    if gelu_approx:
        act = jax.nn.gelu(z, approximate=True)             # EUP tanh path (opt-in)
    else:
        act = _gelu_exact(z)                               # PyTorch-exact erf GELU

    y_ref[0] = act.astype(y_ref.dtype)

    # BN partial sums accumulated in f32 (padded tail batch rows masked out).
    if true_b % tb != 0:
        valid_lanes = jnp.minimum(true_b - pl.program_id(0) * tb, tb) * L
        a = jnp.where(pos < valid_lanes, act, 0.0)
    else:
        a = act
    s1 = jnp.sum(a, axis=1)                                # (3C,)
    s2 = jnp.sum(a * a, axis=1)
    stats_ref[0] = jnp.stack([s1, s2], axis=0)             # lane-dense (2, 3C)


def _bn_apply_kernel(act_ref, scale_ref, shift_ref, o_ref, *, tb, seq_len):
    """out[b] = act[:, b*L:(b+1)*L] * scale + shift  (writes the final NCL layout)."""
    L = seq_len
    scale = scale_ref[...]
    shift = shift_ref[...]
    if tb <= 16:
        y = act_ref[0].astype(jnp.float32) * scale + shift
        for b in range(tb):
            o_ref[b] = y[:, b * L:(b + 1) * L]
    else:
        def body(b, carry):
            start = b * L
            if L % 128 == 0:
                start = pl.multiple_of(start, 128)
            a = act_ref[0, :, pl.ds(start, L)].astype(jnp.float32)
            o_ref[b] = a * scale + shift
            return carry
        lax.fori_loop(0, tb, body, 0)


# --------------------------------------------------------------------------- #
# Tiling helpers
# --------------------------------------------------------------------------- #
def _vmem_capacity_bytes():
    try:
        return int(pltpu.get_tpu_info().vmem_capacity_bytes)
    except Exception:
        return 64 * 1024 * 1024        # conservative (v7x-sized) fallback


def _block_bytes(tb, c_in, c3, L, mm_bytes, act_bytes, fuse_taps):
    lanes = tb * L
    x_in = 2 * c_in * lanes * 4                                   # dbuf f32 input
    rhs = (KW if fuse_taps else 2) * c_in * lanes * mm_bytes      # tap slabs / im2col
    acc = 2 * c3 * lanes * 4                                      # f32 acc + act temp
    y_out = 2 * c3 * lanes * act_bytes                            # dbuf act output
    w = 2 * c3 * KW * c_in * mm_bytes + 8 * c3
    pass1 = x_in + rhs + acc + y_out + w
    pass2 = 2 * c3 * lanes * act_bytes + 2 * c3 * lanes * 4 + c3 * lanes * 4 + 8 * c3
    return max(pass1, pass2) + (1 << 16)


# --------------------------------------------------------------------------- #
# Forward
# --------------------------------------------------------------------------- #
def inception_block(x_ncl, packed, *, eps=EPS, matmul_dtype=jnp.bfloat16,
                    act_dtype=jnp.bfloat16, gelu_approx=False):
    """x_ncl: (B, Cin, L) -> (B, 3*Cout, L); matches PyTorch InceptionBlock.forward
    (train-mode BatchNorm1d, biased variance, eps=1e-5)."""
    B, c_in, L = x_ncl.shape
    w2, b2 = packed["w2"], packed["b2"]
    c3 = w2.shape[0]
    assert w2.shape == (c3, KW * c_in), w2.shape

    mm_dtype = np.dtype(jnp.float32 if matmul_dtype is None else matmul_dtype)
    a_dtype = np.dtype(jnp.float32 if act_dtype is None else act_dtype)

    x_ncl = x_ncl.astype(jnp.float32)
    w2 = w2.astype(mm_dtype)                   # cast the fused weight once, in wrapper
    fuse_taps = c_in < 128                     # large Cin: per-tap matmuls, no im2col

    # ---- per-generation tile sizing ------------------------------------------------
    cap = max(_vmem_capacity_bytes(), 32 * 1024 * 1024)
    budget = (3 * cap) // 8                    # ~48 MiB on 128 MiB chips, ~24 MiB on v7x
    vmem_limit = (3 * cap) // 4                # ~96 MiB / ~48 MiB
    small_vmem = cap <= 80 * 1024 * 1024       # v7x-like: 2 TCs share 64 MiB
    max_tb = min(B, 2048)
    if small_vmem and B >= 2:
        max_tb = min(max_tb, -(-B // 2))       # keep >= 2 grid steps for the 2 TCs
    tb = 1
    for cand in range(1, max_tb + 1):
        if _block_bytes(cand, c_in, c3, L, mm_dtype.itemsize, a_dtype.itemsize,
                        fuse_taps) <= budget:
            tb = cand
    nblk = -(-B // tb)
    b_pad = nblk * tb
    lanes = tb * L

    # ---- wrapper-side layout plumbing: pack tb batch rows along lanes ---------------
    if b_pad != B:
        x_ncl = jnp.pad(x_ncl, ((0, b_pad - B), (0, 0), (0, 0)))
    xp = (x_ncl.reshape(nblk, tb, c_in, L)
               .transpose(0, 2, 1, 3)
               .reshape(nblk, c_in, lanes))

    cparams = pltpu.CompilerParams(dimension_semantics=("parallel",),
                                   vmem_limit_bytes=int(vmem_limit))

    # ---- pass 1: fused conv + GELU + per-block BN partial sums ----------------------
    conv_fn = functools.partial(
        _conv_gelu_stats_kernel, tb=tb, c_in=c_in, c3=c3, seq_len=L, true_b=B,
        matmul_dtype=mm_dtype, fuse_taps=fuse_taps, gelu_approx=gelu_approx)
    act, pstats = pl.pallas_call(
        conv_fn,
        out_shape=(jax.ShapeDtypeStruct((nblk, c3, lanes), a_dtype),
                   jax.ShapeDtypeStruct((nblk, 2, c3), jnp.float32)),
        grid=(nblk,),
        in_specs=[
            pl.BlockSpec((1, c_in, lanes), lambda i: (i, 0, 0)),
            pl.BlockSpec((c3, KW * c_in), lambda i: (0, 0)),
            pl.BlockSpec((c3, 1), lambda i: (0, 0)),
        ],
        out_specs=(
            pl.BlockSpec((1, c3, lanes), lambda i: (i, 0, 0)),
            pl.BlockSpec((1, 2, c3), lambda i: (i, 0, 0)),
        ),
        compiler_params=cparams,
    )(xp, w2, b2)

    # ---- tiny epilogue: fold partial sums into per-channel scale / shift ------------
    count = jnp.float32(B * L)
    tot = jnp.sum(pstats, axis=0)                         # (2, 3C)
    mean = tot[0] / count
    # TODO(synk): E[x^2] - mean^2 can cancel for very large B*L; a centered second
    #             reduction (Welford-style) would be more robust in that regime.
    var = jnp.maximum(tot[1] / count - mean * mean, 0.0)  # biased (train-mode BN)
    inv = lax.rsqrt(var + eps)
    gamma = packed["gamma"].astype(jnp.float32)
    beta = packed["beta"].astype(jnp.float32)
    scale = (gamma * inv).reshape(c3, 1)
    shift = (beta - gamma * mean * inv).reshape(c3, 1)

    # ---- pass 2: streaming normalize, writes the final f32 NCL output ---------------
    bn_fn = functools.partial(_bn_apply_kernel, tb=tb, seq_len=L)
    out = pl.pallas_call(
        bn_fn,
        out_shape=jax.ShapeDtypeStruct((b_pad, c3, L), jnp.float32),
        grid=(nblk,),
        in_specs=[
            pl.BlockSpec((1, c3, lanes), lambda i: (i, 0, 0)),
            pl.BlockSpec((c3, 1), lambda i: (0, 0)),
            pl.BlockSpec((c3, 1), lambda i: (0, 0)),
        ],
        out_specs=pl.BlockSpec((tb, c3, L), lambda i: (i, 0, 0)),
        compiler_params=cparams,
    )(act, scale, shift)

    return out[:B] if b_pad != B else out


# --------------------------------------------------------------------------- #
# Pure-JAX reference (PyTorch-equivalent forward) + self-test
# --------------------------------------------------------------------------- #
def reference(x_ncl, params, eps=EPS):
    outs = []
    for i, k in enumerate(KSIZES):
        w, b = params["w"][i], params["b"][i]
        y = lax.conv_general_dilated(
            x_ncl, w, window_strides=(1,), padding=[(k // 2, k // 2)],
            dimension_numbers=("NCH", "OIH", "NCH"))
        y = y + b[None, :, None]
        y = 0.5 * y * (1.0 + lax.erf(y / jnp.sqrt(2.0)))
        outs.append(y)
    y = jnp.concatenate(outs, axis=1)                     # (B, 3C, L)
    mean = jnp.mean(y, axis=(0, 2), keepdims=True)
    var = jnp.mean((y - mean) ** 2, axis=(0, 2), keepdims=True)
    g = params["gamma"][None, :, None]
    be = params["beta"][None, :, None]
    return (y - mean) * lax.rsqrt(var + eps) * g + be


if __name__ == "__main__":
    B, C_IN, C_OUT, L = 3, 4, 8, 128     # L multiple of 128 keeps all stores lane-dense

    key = jax.random.PRNGKey(0)
    keys = jax.random.split(key, 10)

    params = {"w": [], "b": []}
    for i, k in enumerate(KSIZES):
        bound = 1.0 / math.sqrt(C_IN * k)   # PyTorch Conv1d default init bound
        params["w"].append(jax.random.uniform(
            keys[i], (C_OUT, C_IN, k), jnp.float32, -bound, bound))
        params["b"].append(jax.random.uniform(
            keys[3 + i], (C_OUT,), jnp.float32, -bound, bound))
    n_ch = len(KSIZES) * C_OUT
    params["gamma"] = 1.0 + 0.1 * jax.random.normal(keys[6], (n_ch,), jnp.float32)
    params["beta"] = 0.1 * jax.random.normal(keys[7], (n_ch,), jnp.float32)

    x = jax.random.normal(keys[8], (B, C_IN, L), jnp.float32)

    packed = pack_params(params)            # host-side, outside the traced path
    ref = jax.block_until_ready(reference(x, params))

    # Exact-dtype path: tight check against the PyTorch-equivalent reference.
    fwd_f32 = jax.jit(functools.partial(inception_block,
                                        matmul_dtype=jnp.float32,
                                        act_dtype=jnp.float32))
    out_f32 = jax.block_until_ready(fwd_f32(x, packed))
    assert out_f32.shape == (B, n_ch, L), out_f32.shape
    np.testing.assert_allclose(np.asarray(out_f32), np.asarray(ref),
                               rtol=1e-3, atol=1e-3)

    # Default fast path (bf16 MXU inputs + bf16 activation spill): sanity check only.
    fwd = jax.jit(inception_block)
    out = jax.block_until_ready(fwd(x, packed))
    assert out.shape == (B, n_ch, L), out.shape
    np.testing.assert_allclose(np.asarray(out), np.asarray(ref),
                               rtol=1e-1, atol=1e-1)

    print("KERNEL_OK")
</pallas_src>

<mosaic_0001>
module attributes {stable_mosaic.version = 11 : i64} {
  func.func @_bn_apply_kernel(%arg0: i32, %arg1: memref<1x24x256xf32, #tpu.memory_space<vmem>>, %arg2: memref<24x1xf32, #tpu.memory_space<vmem>>, %arg3: memref<24x1xf32, #tpu.memory_space<vmem>>, %arg4: memref<2x24x128xf32, #tpu.memory_space<vmem>>) attributes {dimension_semantics = [#tpu.dimension_semantics<parallel>], iteration_bounds = array<i64: 2>, scalar_prefetch = 0 : i64, scratch_operands = 0 : i64, tpu.core_type = #tpu.core_type<tc>, window_params = [{transform_indices = @transform_0, window_bounds = array<i64: 1, 24, 256>}, {pipeline_mode = #tpu.pipeline_mode<synchronous>, transform_indices = @transform_1, window_bounds = array<i64: 24, 1>}, {pipeline_mode = #tpu.pipeline_mode<synchronous>, transform_indices = @transform_2, window_bounds = array<i64: 24, 1>}, {transform_indices = @transform_3, window_bounds = array<i64: 2, 24, 128>}]} {
    %c0 = arith.constant 0 : index
    %c0_0 = arith.constant 0 : index
    %0 = vector.load %arg2[%c0, %c0_0] : memref<24x1xf32, #tpu.memory_space<vmem>>, vector<24x1xf32>
    %c0_1 = arith.constant 0 : index
    %c0_2 = arith.constant 0 : index
    %1 = vector.load %arg3[%c0_1, %c0_2] : memref<24x1xf32, #tpu.memory_space<vmem>>, vector<24x1xf32>
    %c0_3 = arith.constant 0 : index
    %c0_4 = arith.constant 0 : index
    %c0_5 = arith.constant 0 : index
    %2 = vector.load %arg1[%c0_3, %c0_4, %c0_5] : memref<1x24x256xf32, #tpu.memory_space<vmem>>, vector<1x24x256xf32>
    %3 = vector.shape_cast %2 : vector<1x24x256xf32> to vector<24x256xf32>
    %4 = vector.broadcast %0 : vector<24x1xf32> to vector<24x256xf32>
    %5 = arith.mulf %3, %4 : vector<24x256xf32>
    %6 = vector.broadcast %1 : vector<24x1xf32> to vector<24x256xf32>
    %7 = arith.addf %5, %6 : vector<24x256xf32>
    %8 = vector.extract_strided_slice %7 {offsets = [0, 0], sizes = [24, 128], strides = [1, 1]} : vector<24x256xf32> to vector<24x128xf32>
    %c0_6 = arith.constant 0 : index
    %c0_7 = arith.constant 0 : index
    %c0_8 = arith.constant 0 : index
    %9 = vector.load %arg4[%c0_6, %c0_7, %c0_8] : memref<2x24x128xf32, #tpu.memory_space<vmem>>, vector<1x24x128xf32>
    %10 = vector.shape_cast %9 : vector<1x24x128xf32> to vector<24x128xf32>
    %11 = vector.shape_cast %8 : vector<24x128xf32> to vector<1x24x128xf32>
    tpu.vector_store %arg4[%c0_6, %c0_7, %c0_8], %11 {strides = array<i32>} : memref<2x24x128xf32, #tpu.memory_space<vmem>>, vector<1x24x128xf32>,
    %12 = vector.extract_strided_slice %7 {offsets = [0, 128], sizes = [24, 128], strides = [1, 1]} : vector<24x256xf32> to vector<24x128xf32>
    %c1 = arith.constant 1 : index
    %c0_9 = arith.constant 0 : index
    %c0_10 = arith.constant 0 : index
    %13 = vector.load %arg4[%c1, %c0_9, %c0_10] : memref<2x24x128xf32, #tpu.memory_space<vmem>>, vector<1x24x128xf32>
    %14 = vector.shape_cast %13 : vector<1x24x128xf32> to vector<24x128xf32>
    %15 = vector.shape_cast %12 : vector<24x128xf32> to vector<1x24x128xf32>
    tpu.vector_store %arg4[%c1, %c0_9, %c0_10], %15 {strides = array<i32>} : memref<2x24x128xf32, #tpu.memory_space<vmem>>, vector<1x24x128xf32>,
    return
  }
  func.func @transform_0(%arg0: i32) -> (i32, i32, i32) {
    %c0_i32 = arith.constant 0 : i32
    %c0_i32_0 = arith.constant 0 : i32
    %c0_i32_1 = arith.constant 0 : i32
    return %arg0, %c0_i32, %c0_i32_0 : i32, i32, i32
  }
  func.func @transform_1(%arg0: i32) -> (i32, i32) {
    %c0_i32 = arith.constant 0 : i32
    %c0_i32_0 = arith.constant 0 : i32
    %c0_i32_1 = arith.constant 0 : i32
    return %c0_i32, %c0_i32_0 : i32, i32
  }
  func.func @transform_2(%arg0: i32) -> (i32, i32) {
    %c0_i32 = arith.constant 0 : i32
    %c0_i32_0 = arith.constant 0 : i32
    %c0_i32_1 = arith.constant 0 : i32
    return %c0_i32, %c0_i32_0 : i32, i32
  }
  func.func @transform_3(%arg0: i32) -> (i32, i32, i32) {
    %c0_i32 = arith.constant 0 : i32
    %c0_i32_0 = arith.constant 0 : i32
    %c0_i32_1 = arith.constant 0 : i32
    return %arg0, %c0_i32, %c0_i32_0 : i32, i32, i32
  }
}

module attributes {stable_mosaic.version = 11 : i64} {
  func.func @_conv_gelu_stats_kernel(%arg0: i32, %arg1: memref<1x4x256xf32, #tpu.memory_space<vmem>>, %arg2: memref<24x20xf32, #tpu.memory_space<vmem>>, %arg3: memref<24x1xf32, #tpu.memory_space<vmem>>, %arg4: memref<1x24x256xf32, #tpu.memory_space<vmem>>, %arg5: memref<1x2x24xf32, #tpu.memory_space<vmem>>) attributes {dimension_semantics = [#tpu.dimension_semantics<parallel>], iteration_bounds = array<i64: 2>, scalar_prefetch = 0 : i64, scratch_operands = 0 : i64, tpu.core_type = #tpu.core_type<tc>, window_params = [{transform_indices = @transform_0, window_bounds = array<i64: 1, 4, 256>}, {pipeline_mode = #tpu.pipeline_mode<synchronous>, transform_indices = @transform_1, window_bounds = array<i64: 24, 20>}, {pipeline_mode = #tpu.pipeline_mode<synchronous>, transform_indices = @transform_2, window_bounds = array<i64: 24, 1>}, {transform_indices = @transform_3, window_bounds = array<i64: 1, 24, 256>}, {transform_indices = @transform_4, window_bounds = array<i64: 1, 2, 24>}]} {
    %c0 = arith.constant 0 : index
    %c0_0 = arith.constant 0 : index
    %c0_1 = arith.constant 0 : index
    %0 = vector.load %arg1[%c0, %c0_0, %c0_1] : memref<1x4x256xf32, #tpu.memory_space<vmem>>, vector<1x4x256xf32>
    %1 = vector.shape_cast %0 : vector<1x4x256xf32> to vector<4x256xf32>
    %2 = tpu.iota {dimensions = array<i32: 1>} : vector<1x256xi32>
    %c128_i32 = arith.constant 128 : i32
    %c0_i32 = arith.constant 0 : i32
    %3 = arith.cmpi eq, %c128_i32, %c0_i32 : i32
    %c1_i32 = arith.constant 1 : i32
    %4 = arith.select %3, %c1_i32, %c128_i32 : i32
    %5 = vector.broadcast %4 : i32 to vector<1x256xi32>
    %6 = arith.remsi %2, %5 : vector<1x256xi32>
    %c0_i32_2 = arith.constant 0 : i32
    %7 = vector.broadcast %c0_i32_2 : i32 to vector<1x256xi32>
    %8 = arith.cmpi ne, %6, %7 : vector<1x256xi32>
    %c0_i32_3 = arith.constant 0 : i32
    %9 = vector.broadcast %c0_i32_3 : i32 to vector<1x256xi32>
    %10 = arith.cmpi slt, %6, %9 : vector<1x256xi32>
    %c0_i32_4 = arith.constant 0 : i32
    %11 = arith.cmpi slt, %4, %c0_i32_4 : i32
    %12 = vector.broadcast %11 : i1 to vector<1x256xi1>
    %13 = vector.broadcast %12 : vector<1x256xi1> to vector<1x256xi1>
    %14 = arith.xori %10, %13 : vector<1x256xi1>
    %15 = arith.andi %14, %8 : vector<1x256xi1>
    %16 = vector.broadcast %4 : i32 to vector<1x256xi32>
    %17 = arith.addi %6, %16 : vector<1x256xi32>
    %18 = arith.select %15, %17, %6 : vector<1x256xi1>, vector<1x256xi32>
    %c0_5 = arith.constant 0 : index
    %c0_6 = arith.constant 0 : index
    %19 = vector.load %arg2[%c0_5, %c0_6] : memref<24x20xf32, #tpu.memory_space<vmem>>, vector<24x20xf32>
    %c2_i32 = arith.constant 2 : i32
    %20 = tpu.dynamic_rotate %1 by %c2_i32 dim 1 : vector<4x256xf32>, i32 -> vector<4x256xf32>
    %c2_i32_7 = arith.constant 2 : i32
    %21 = vector.broadcast %c2_i32_7 : i32 to vector<1x256xi32>
    %22 = arith.cmpi sge, %18, %21 : vector<1x256xi32>
    %c0_i32_8 = arith.constant 0 : i32
    %23 = arith.sitofp %c0_i32_8 : i32 to f32
    %24 = vector.shape_cast %22 : vector<1x256xi1> to vector<1x256xi1>
    %25 = vector.broadcast %24 : vector<1x256xi1> to vector<4x256xi1>
    %26 = vector.broadcast %23 : f32 to vector<4x256xf32>
    %27 = arith.select %25, %20, %26 : vector<4x256xi1>, vector<4x256xf32>
    %c1_i32_9 = arith.constant 1 : i32
    %28 = tpu.dynamic_rotate %1 by %c1_i32_9 dim 1 : vector<4x256xf32>, i32 -> vector<4x256xf32>
    %c1_i32_10 = arith.constant 1 : i32
    %29 = vector.broadcast %c1_i32_10 : i32 to vector<1x256xi32>
    %30 = arith.cmpi sge, %18, %29 : vector<1x256xi32>
    %c0_i32_11 = arith.constant 0 : i32
    %31 = arith.sitofp %c0_i32_11 : i32 to f32
    %32 = vector.shape_cast %30 : vector<1x256xi1> to vector<1x256xi1>
    %33 = vector.broadcast %32 : vector<1x256xi1> to vector<4x256xi1>
    %34 = vector.broadcast %31 : f32 to vector<4x256xf32>
    %35 = arith.select %33, %28, %34 : vector<4x256xi1>, vector<4x256xf32>
    %c255_i32 = arith.constant 255 : i32
    %36 = tpu.dynamic_rotate %1 by %c255_i32 dim 1 : vector<4x256xf32>, i32 -> vector<4x256xf32>
    %c127_i32 = arith.constant 127 : i32
    %37 = vector.broadcast %c127_i32 : i32 to vector<1x256xi32>
    %38 = arith.cmpi slt, %18, %37 : vector<1x256xi32>
    %c0_i32_12 = arith.constant 0 : i32
    %39 = arith.sitofp %c0_i32_12 : i32 to f32
    %40 = vector.shape_cast %38 : vector<1x256xi1> to vector<1x256xi1>
    %41 = vector.broadcast %40 : vector<1x256xi1> to vector<4x256xi1>
    %42 = vector.broadcast %39 : f32 to vector<4x256xf32>
    %43 = arith.select %41, %36, %42 : vector<4x256xi1>, vector<4x256xf32>
    %c254_i32 = arith.constant 254 : i32
    %44 = tpu.dynamic_rotate %1 by %c254_i32 dim 1 : vector<4x256xf32>, i32 -> vector<4x256xf32>
    %c126_i32 = arith.constant 126 : i32
    %45 = vector.broadcast %c126_i32 : i32 to vector<1x256xi32>
    %46 = arith.cmpi slt, %18, %45 : vector<1x256xi32>
    %c0_i32_13 = arith.constant 0 : i32
    %47 = arith.sitofp %c0_i32_13 : i32 to f32
    %48 = vector.shape_cast %46 : vector<1x256xi1> to vector<1x256xi1>
    %49 = vector.broadcast %48 : vector<1x256xi1> to vector<4x256xi1>
    %50 = vector.broadcast %47 : f32 to vector<4x256xf32>
    %51 = arith.select %49, %44, %50 : vector<4x256xi1>, vector<4x256xf32>
    %52 = tpu.concatenate %27, %35, %1, %43, %51 in 0 : vector<4x256xf32>, vector<4x256xf32>, vector<4x256xf32>, vector<4x256xf32>, vector<4x256xf32> -> vector<20x256xf32>
    %cst = arith.constant dense<0.000000e+00> : vector<24x256xf32>
    %53 = tpu.matmul %19, %52, %cst {dimension_numbers = #tpu.dot_dimension_numbers<[1], [0], [0], [1], [0, 0, 1, 1], [], []>} : vector<24x20xf32>, vector<20x256xf32>, vector<24x256xf32> -> vector<24x256xf32>
    %c0_14 = arith.constant 0 : index
    %c0_15 = arith.constant 0 : index
    %54 = vector.load %arg3[%c0_14, %c0_15] : memref<24x1xf32, #tpu.memory_space<vmem>>, vector<24x1xf32>
    %55 = vector.broadcast %54 : vector<24x1xf32> to vector<24x256xf32>
    %56 = arith.addf %53, %55 : vector<24x256xf32>
    %cst_16 = arith.constant 5.000000e-01 : f32
    %57 = vector.broadcast %cst_16 : f32 to vector<24x256xf32>
    %58 = arith.mulf %57, %56 : vector<24x256xf32>
    %cst_17 = arith.constant 0.707106769 : f32
    %59 = vector.broadcast %cst_17 : f32 to vector<24x256xf32>
    %60 = arith.mulf %56, %59 : vector<24x256xf32>
    %61 = math.erf %60 : vector<24x256xf32>
    %cst_18 = arith.constant 1.000000e+00 : f32
    %62 = vector.broadcast %cst_18 : f32 to vector<24x256xf32>
    %63 = arith.addf %62, %61 : vector<24x256xf32>
    %64 = arith.mulf %58, %63 : vector<24x256xf32>
    %c0_19 = arith.constant 0 : index
    %c0_20 = arith.constant 0 : index
    %c0_21 = arith.constant 0 : index
    %65 = vector.load %arg4[%c0_19, %c0_20, %c0_21] : memref<1x24x256xf32, #tpu.memory_space<vmem>>, vector<1x24x256xf32>
    %66 = vector.shape_cast %65 : vector<1x24x256xf32> to vector<24x256xf32>
    %67 = vector.shape_cast %64 : vector<24x256xf32> to vector<1x24x256xf32>
    tpu.vector_store %arg4[%c0_19, %c0_20, %c0_21], %67 {strides = array<i32>} : memref<1x24x256xf32, #tpu.memory_space<vmem>>, vector<1x24x256xf32>,
    %c2_i32_22 = arith.constant 2 : i32
    %68 = arith.muli %arg0, %c2_i32_22 : i32
    %c3_i32 = arith.constant 3 : i32
    %69 = arith.subi %c3_i32, %68 : i32
    %c2_i32_23 = arith.constant 2 : i32
    %70 = arith.minsi %69, %c2_i32_23 : i32
    %c128_i32_24 = arith.constant 128 : i32
    %71 = arith.muli %70, %c128_i32_24 : i32
    %72 = vector.broadcast %71 : i32 to vector<1x256xi32>
    %73 = arith.cmpi slt, %2, %72 : vector<1x256xi32>
    %cst_25 = arith.constant 0.000000e+00 : f32
    %74 = vector.shape_cast %73 : vector<1x256xi1> to vector<1x256xi1>
    %75 = vector.broadcast %74 : vector<1x256xi1> to vector<24x256xi1>
    %76 = vector.broadcast %cst_25 : f32 to vector<24x256xf32>
    %77 = arith.select %75, %64, %76 : vector<24x256xi1>, vector<24x256xf32>
    %cst_26 = arith.constant dense<0.000000e+00> : vector<24xf32>
    %78 = vector.multi_reduction <add>, %77, %cst_26 [1] : vector<24x256xf32> to vector<24xf32>
    %79 = arith.mulf %77, %77 : vector<24x256xf32>
    %cst_27 = arith.constant dense<0.000000e+00> : vector<24xf32>
    %80 = vector.multi_reduction <add>, %79, %cst_27 [1] : vector<24x256xf32> to vector<24xf32>
    %81 = vector.shape_cast %78 : vector<24xf32> to vector<1x24xf32>
    %82 = vector.shape_cast %80 : vector<24xf32> to vector<1x24xf32>
    %83 = tpu.concatenate %81, %82 in 0 : vector<1x24xf32>, vector<1x24xf32> -> vector<2x24xf32>
    %c0_28 = arith.constant 0 : index
    %c0_29 = arith.constant 0 : index
    %c0_30 = arith.constant 0 : index
    %84 = vector.load %arg5[%c0_28, %c0_29, %c0_30] : memref<1x2x24xf32, #tpu.memory_space<vmem>>, vector<1x2x24xf32>
    %85 = vector.shape_cast %84 : vector<1x2x24xf32> to vector<2x24xf32>
    %86 = vector.shape_cast %83 : vector<2x24xf32> to vector<1x2x24xf32>
    tpu.vector_store %arg5[%c0_28, %c0_29, %c0_30], %86 {strides = array<i32>} : memref<1x2x24xf32, #tpu.memory_space<vmem>>, vector<1x2x24xf32>,
    return
  }
  func.func @transform_0(%arg0: i32) -> (i32, i32, i32) {
    %c0_i32 = arith.constant 0 : i32
    %c0_i32_0 = arith.constant 0 : i32
    %c0_i32_1 = arith.constant 0 : i32
    return %arg0, %c0_i32, %c0_i32_0 : i32, i32, i32
  }
  func.func @transform_1(%arg0: i32) -> (i32, i32) {
    %c0_i32 = arith.constant 0 : i32
    %c0_i32_0 = arith.constant 0 : i32
    %c0_i32_1 = arith.constant 0 : i32
    return %c0_i32, %c0_i32_0 : i32, i32
  }
  func.func @transform_2(%arg0: i32) -> (i32, i32) {
    %c0_i32 = arith.constant 0 : i32
    %c0_i32_0 = arith.constant 0 : i32
    %c0_i32_1 = arith.constant 0 : i32
    return %c0_i32, %c0_i32_0 : i32, i32
  }
  func.func @transform_3(%arg0: i32) -> (i32, i32, i32) {
    %c0_i32 = arith.constant 0 : i32
    %c0_i32_0 = arith.constant 0 : i32
    %c0_i32_1 = arith.constant 0 : i32
    return %arg0, %c0_i32, %c0_i32_0 : i32, i32, i32
  }
  func.func @transform_4(%arg0: i32) -> (i32, i32, i32) {
    %c0_i32 = arith.constant 0 : i32
    %c0_i32_0 = arith.constant 0 : i32
    %c0_i32_1 = arith.constant 0 : i32
    return %arg0, %c0_i32, %c0_i32_0 : i32, i32, i32
  }
}

</mosaic_0001>

<bundles_post_ra>
// kernel: inception_block.3
= control target key start
LH: loop header
LB: loop body
LE: loop exit
PB: predicated region body
PF: predicated region fallthrough
CT: control target
= control target key end

     0   :  { %s349_s12 = smov 0   ;;  %s384_s0 = inlined_call_operand.vmem [shape: f32[2,24,256], index: 0, kind: input, shape index: {}]   ;;  %s385_s1 = inlined_call_operand.vmem [shape: f32[24,1], index: 1, kind: input, shape index: {}]   ;;  %s386_s2 = inlined_call_operand.vmem [shape: f32[24,1], index: 2, kind: input, shape index: {}]   ;;  %s387_s3 = inlined_call_operand.vmem [shape: f32[4,24,128], index: 3, kind: output, shape index: {}]  }
   0x1 LB: > { %s293_s13 = sadd.s32 4294967295, %s326_s12   ;;  %p297_p0 = scmp.ge.s32.totalorder %s326_s12, 1  ;;  %s326_s12 = sphi %s349_s12, %s13_s12  }
   0x2   : > { %p137_p1 = scmp.lt.s32.totalorder %s326_s12, 3 }
   0x4   : > { %p138_p2 = pnand %p297_p0, %p137_p1 }
   0x5   : > { %p162_p3 = scmp.lt.s32.totalorder (!%p138_p2), %s293_s13, 1  ;;  %s299_s26 = sshll.u32 (!%p138_p2), %s293_s13, 1 }
   0x6   : > { %141 = sbr.rel (%p138_p2) target bundleno = 142 (0x8e), region = 32  ;;  %p168_p4 = scmp.lt.s32.totalorder (!%p138_p2), %s299_s26, 3 }
   0xb   : > { %v176_v0 = vld [vmem:[%s385_s1 + $0x10] sm:$0xff]  ;;  %v174_v1 = vld [vmem:[%s385_s1] sm:$0xff]  ;;  %v328_v2 = vmov 0   ;;  %v178_v3 = vld [vmem:[%s386_s2 + $0x8] sm:$0xff]  ;;  %s389_s13 = smov (!%p162_p3, %s293_s13), 1  ;;  %s391_s26 = smov (!%p168_p4, %s299_s26), 3 }
   0xc   : > { %318 = vset.pattern.permute.xlu1 %v328_v2  ;;  %317 = vset.pattern.permute.xlu0 %v328_v2  ;;  %v177_v4 = vld [vmem:[%s386_s2] sm:$0xff]  ;;  %v175_v5 = vld [vmem:[%s385_s1 + $0x8] sm:$0xff]  ;;  %v179_v6 = vld [vmem:[%s386_s2 + $0x10] sm:$0xff]  ;;  %s306_s27 = smul.u32 48, %s389_s13 }
   0xd   : > { %198 = vperm.xlu1 %318, %v176_v0   ;;  %188 = vperm.xlu0 %317, %v174_v1   ;;  %s307_s4 = smul.u32 24, %s391_s26 }
   0xe   : > { %319 = vset.pattern.permute.xlu2 %v328_v2  ;;  %s166_s30 = scalar_lea.vmem %s384_s0, %s306_s27 }
   0xf   : > { %214 = vperm.xlu2 %319, %v178_v3   ;;  %v184_v8 = vld [vmem:[%s166_s30 + $0x20] sm:$0xff]  ;;  %v185_v9 = vld [vmem:[%s166_s30 + $0x28] sm:$0xff]  ;;  %s172_s7 = scalar_lea.vmem %s387_s3, %s307_s4  ;;  %v182_v19 = vld [vmem:[%s166_s30 + $0x10] sm:$0xff] }
  0x10   : > { %v180_v17 = vld [vmem:[%s166_s30] sm:$0xff]  ;;  %v181_v18 = vld [vmem:[%s166_s30 + $0x8] sm:$0xff]  ;;  %v183_v20 = vld [vmem:[%s166_s30 + $0x18] sm:$0xff] }
  0x15   : > { %209 = vperm.xlu1 %318, %v177_v4   ;;  %193 = vperm.xlu0 %317, %v175_v5  }
  0x17   : > { %219 = vperm.xlu2 %319, %v179_v6  }
  0x69   : > { %v215_v7 = vpop.permute.xlu2 %214 }
  0x71   : > { %v220_v10 = vpop.permute.xlu2 %219 }
  0x7f   : > { %v199_v11 = vpop.permute.xlu1 %198  ;;  %v189_v12 = vpop.permute.xlu0 %188 }
  0x80   : > { %v205_v13 = vmul.f32 %v199_v11, %v184_v8  ;;  %v206_v14 = vmul.f32 %v199_v11, %v185_v9  ;;  %v201_v21 = vmul.f32 %v189_v12, %v180_v17  ;;  %v202_v22 = vmul.f32 %v189_v12, %v181_v18 }
  0x82   : > { %v226_v15 = vadd.f32 %v220_v10, %v205_v13  ;;  %v227_v16 = vadd.f32 %v220_v10, %v206_v14 }
  0x84   : > { %230 = vst [vmem:[%s172_s7 + $0x10] sm:$0xff] %v226_v15 }
  0x85   : > { %303 = vst [vmem:[%s172_s7 + $0x28] sm:$0xff] %v227_v16 }
  0x87   : > { %v210_v23 = vpop.permute.xlu1 %209  ;;  %v194_v24 = vpop.permute.xlu0 %193 }
  0x88   : > { %v222_v25 = vadd.f32 %v210_v23, %v201_v21  ;;  %v223_v26 = vadd.f32 %v210_v23, %v202_v22  ;;  %v203_v27 = vmul.f32 %v194_v24, %v182_v19  ;;  %v204_v28 = vmul.f32 %v194_v24, %v183_v20 }
  0x8a   : > { %228 = vst [vmem:[%s172_s7] sm:$0xff] %v222_v25  ;;  %v224_v29 = vadd.f32 %v215_v7, %v203_v27  ;;  %v225_v30 = vadd.f32 %v215_v7, %v204_v28 }
  0x8b   : > { %301 = vst [vmem:[%s172_s7 + $0x18] sm:$0xff] %v223_v26 }
  0x8c   : > { %229 = vst [vmem:[%s172_s7 + $0x8] sm:$0xff] %v224_v29 }
  0x8d   : > { %302 = vst [vmem:[%s172_s7 + $0x20] sm:$0xff] %v225_v30 }
  0x8e PF: > { %s13_s12 = sadd.s32 1, %s326_s12  }
  0x8f   : > { %p10_p5 = scmp.ge.s32.totalorder %s13_s12, 4  }
  0x91   :  { %12 = sbr.rel (!%p10_p5) target bundleno = 1 (0x1), region = 63 }

// kernel: inception_block.2
= control target key start
LH: loop header
LB: loop body
LE: loop exit
PB: predicated region body
PF: predicated region fallthrough
CT: control target
= control target key end

     0   :  { %s969_s15 = smov 0   ;;  %s1251_s0 = inlined_call_operand.vmem [shape: f32[2,4,256], index: 0, kind: input, shape index: {}]   ;;  %s1252_s1 = inlined_call_operand.vmem [shape: f32[24,20], index: 1, kind: input, shape index: {}]   ;;  %s1253_s2 = inlined_call_operand.vmem [shape: f32[24,1], index: 2, kind: input, shape index: {}]   ;;  %s1254_s3 = inlined_call_operand.vmem [shape: f32[2,24,256], index: 3, kind: output, shape index: {0}]   ;;  %s1255_s4 = inlined_call_operand.vmem [shape: f32[2,2,24], index: 4, kind: output, shape index: {1}]  }
   0x1 LB: > { %s975_s16 = sadd.s32 4294967295, %s937_s15   ;;  %p857_p0 = scmp.ge.s32.totalorder %s937_s15, 1  ;;  %s937_s15 = sphi %s969_s15, %s15_s15  }
   0x2   : > { %p165_p1 = scmp.lt.s32.totalorder %s937_s15, 3 }
   0x4   : > { %p166_p2 = pnand %p857_p0, %p165_p1 }
   0x5   : > { %p195_p3 = scmp.lt.s32.totalorder (!%p166_p2), %s975_s16, 1  ;;  %s939_s22 = smov (!%p166_p2), 2  }
   0x6   : > { %169 = sbr.rel (%p166_p2) target bundleno = 524 (0x20c), region = 32  ;;  %s940_s23 = smov (!%p166_p2), 127  }
   0x7   : > { %s941_s24 = smov (!%p166_p2), 126   ;;  %s942_s25 = smov (!%p166_p2), 1  }
   0x8   : > { %s876_s12 = sshll.u32 (!%p166_p2), %s975_s16, 1 }
   0x9   : > { %s1131_s13 = ssub.s32 (!%p166_p2), 3, %s876_s12 }
   0xa   : > { %p701_p4 = scmp.lt.s32.totalorder (!%p166_p2), %s1131_s13, 2 }
   0xb   : > { %s981_s17 = scalar_select %p195_p3, %s975_s16, 1  ;;  %v210_v12 = vlaneseq  ;;  %v344_v19 = vld [vmem:[%s1253_s2 + $0x8] sm:$0xff]  ;;  %v345_v20 = vld [vmem:[%s1253_s2 + $0x10] sm:$0xff]  ;;  %v943_v21 = vmov 0   ;;  %v343_v22 = vld [vmem:[%s1253_s2] sm:$0xff]  ;;  %vm338_vm4 = vcmask 1043456  }
   0xc   : > { %917 = vset.pattern.permute.xlu0 %v943_v21  ;;  %918 = vset.pattern.permute.xlu1 %v943_v21  ;;  %v237_v57 = vld [vmem:[%s1252_s1] sm:$0xff]  ;;  %vm361_vm11 = vcmask 162816   ;;  %v238_v58 = vld [vmem:[%s1252_s1 + $0x8] sm:$0xff]  ;;  %v239_v59 = vld [vmem:[%s1252_s1 + $0x10] sm:$0xff]  ;;  %s1263_s13 = smov (!%p701_p4, %s1131_s13), 2 }
   0xd   : > { %s880_s18 = sshll.u32 %s981_s17, 3  ;;  %v987_v13 = vand.u32 127, %v210_v12  ;;  %916 = vset.pattern.permute.xlu2 %v943_v21  ;;  %s887_s14 = smul.u32 48, %s981_s17 }
   0xe   : > { %s199_s21 = scalar_lea.vmem %s1251_s0, %s880_s18  ;;  %s877_s16 = sshll.u32 %s1263_s13, 7 }
   0xf   : > { %v209_v0 = vld [vmem:[%s199_s21] sm:$0xff]  ;;  %v990_v14 = vadd.s32 128, %v987_v13  ;;  %vm290_vm0 = vcmp.lt.s32.totalorder %v987_v13, 127  ;;  %vm310_vm2 = vcmp.lt.s32.totalorder %v987_v13, 126  ;;  %vm250_vm5 = vcmp.lt.s32.totalorder %v987_v13, 2  ;;  %s1184_s20 = scalar_lea.vmem %s1254_s3, %s887_s14  ;;  %s861_s21 = sshll.u32 %s981_s17, 1 }
  0x10   : > { %241 = vst [vmem:[#allocation1] ss:$2 sm:$0xff] %v209_v0  ;;  %vm253_vm6 = vcmp.ge.s32.totalorder %v987_v13, 2  ;;  %vm270_vm7 = vcmp.lt.s32.totalorder %v987_v13, 1  ;;  %vm273_vm8 = vcmp.ge.s32.totalorder %v987_v13, 1 }
  0x11   : > { %v993_v15 = vand.u32 127, %v990_v14 }
  0x13   : > { %vm294_vm1 = vcmp.lt.s32.totalorder %v993_v15, 127  ;;  %vm314_vm3 = vcmp.lt.s32.totalorder %v993_v15, 126  ;;  %vm274_vm9 = vcmp.ge.s32.totalorder %v993_v15, 1  ;;  %vm254_vm10 = vcmp.ge.s32.totalorder %v993_v15, 2 }
  0x17   : > { %v242_v1 = vld.sshfl [vmem:[#allocation1] sm:$0xff pattern:$0x75316420]  ;;  %v243_v2 = vld.sshfl [vmem:[#allocation1 + $0x8] sm:$0xff pattern:$0x75316420] }
  0x18   : > { %261 = vst [vmem:[#allocation1] ss:$2 sm:$0xff] %v209_v0  ;;  %v911_v3 = vpack.i.bf16 %v243_v2, %v242_v1 }
  0x1a   : > { %912 = vrot.lane.b32.xlu2 %v911_v3, %s939_s22 }
  0x1f   : > { %v262_v4 = vld.sshfl [vmem:[#allocation1] sm:$0xff pattern:$0x75316420]  ;;  %v263_v5 = vld.sshfl [vmem:[#allocation1 + $0x8] sm:$0xff pattern:$0x75316420] }
  0x20   : > { %281 = vst [vmem:[#allocation1] ss:$2 sm:$0xff] %v209_v0  ;;  %v906_v11 = vpack.i.bf16 %v263_v5, %v262_v4 }
  0x22   : > { %348 = vperm.xlu2 %916, %v343_v22  }
  0x27   : > { %v282_v6 = vld.sshfl [vmem:[#allocation1] sm:$0xff pattern:$0x75316420]  ;;  %v283_v7 = vld.sshfl [vmem:[#allocation1 + $0x8] sm:$0xff pattern:$0x75316420] }
  0x28   : > { %v901_v8 = vpack.i.bf16 %v283_v7, %v282_v6  ;;  %301 = vst [vmem:[#allocation1] ss:$2 sm:$0xff] %v209_v0 }
  0x2a   : > { %902 = vrot.lane.b32.xlu0 %v901_v8, %s940_s23 }
  0x2f   : > { %v303_v9 = vld.sshfl [vmem:[#allocation1 + $0x8] sm:$0xff pattern:$0x75316420]  ;;  %v302_v10 = vld.sshfl [vmem:[#allocation1] sm:$0xff pattern:$0x75316420] }
  0x30   : > { %308 = vrot.lane.b32.xlu1 %v303_v9, %s941_s24  ;;  %327 = vst [vmem:[#allocation1] ss:$2 sm:$0xff] %v209_v0 }
  0x32   : > { %306 = vrot.lane.b32.xlu0 %v302_v10, %s941_s24  ;;  %s208_s24 = scalar_lea.vmem %s1255_s4, %s861_s21 }
  0x37   : > { %v328_v30 = vld.sshfl [vmem:[#allocation1] sm:$0xff pattern:$0x75316420]  ;;  %v329_v33 = vld.sshfl [vmem:[#allocation1 + $0x8] sm:$0xff pattern:$0x75316420] }
  0x38   : > { %907 = vrot.lane.b32.xlu1 %v906_v11, %s942_s25 }
  0x3a   : > { %353 = vperm.xlu0 %917, %v344_v19  }
  0x40   : > { %358 = vperm.xlu1 %918, %v345_v20  }
  0x74   : > { %v913_v29 = vpop.permute.xlu2 %912 }
  0x75   : > { %v915_v36 = vunpack.i.h.bf16 %v913_v29  ;;  %v914_v40 = vunpack.i.l.bf16 %v913_v29 }
  0x77   : > { %v252_v43 = vsel %vm250_vm5, %v915_v36, %v914_v40  ;;  %v251_v46 = vsel %vm250_vm5, %v914_v40, %v915_v36 }
  0x78   : > { %v259_v49 = vsel %vm253_vm6, %v252_v43, 0.0  ;;  %v260_v51 = vsel %vm254_vm10, %v251_v46, 0.0 }
  0x7c   : > { %v349_v60 = vpop.permute.xlu2 %348 }
  0x9c   : > { %v903_v16 = vpop.permute.xlu0 %902 }
  0x9d   : > { %v905_v17 = vunpack.i.h.bf16 %v903_v16  ;;  %v904_v18 = vunpack.i.l.bf16 %v903_v16 }
  0x9f   : > { %v291_v23 = vsel %vm290_vm0, %v904_v18, %v905_v17  ;;  %v292_v24 = vsel %vm290_vm0, %v905_v17, %v904_v18 }
  0xa0   : > { %v299_v25 = vsel %vm290_vm0, %v291_v23, 0.0  ;;  %v300_v26 = vsel %vm294_vm1, %v292_v24, 0.0 }
  0xa1   : > { %v334_v28 = vrot.slane %v299_v25, 4  ;;  %v335_v31 = vrot.slane %v300_v26, 4 }
  0xa2   : > { %v309_v27 = vpop.permute.xlu1 %308 }
  0xa3   : > { %v341_v39 = vsel %vm338_vm4, %v328_v30, %v334_v28  ;;  %v342_v41 = vsel %vm338_vm4, %v329_v33, %v335_v31 }
  0xa4   : > { %v307_v32 = vpop.permute.xlu0 %306 }
  0xa5   : > { %v311_v34 = vsel %vm310_vm2, %v307_v32, %v309_v27  ;;  %v312_v35 = vsel %vm310_vm2, %v309_v27, %v307_v32 }
  0xa6   : > { %v319_v37 = vsel %vm310_vm2, %v311_v34, 0.0  ;;  %v320_v38 = vsel %vm314_vm3, %v312_v35, 0.0 }
  0xa7   : > { %862 = vmatpush.msk.msra.mxu0 %vm338_vm4, %v319_v37  ;;  %881 = vmatpush.msk.msra.mxu2 %vm338_vm4, %v319_v37 }
  0xa8   : > { %866 = vmatpush.msk.msra.mxu1 %vm338_vm4, %v320_v38  ;;  %884 = vmatpush.msk.msra.mxu3 %vm338_vm4, %v320_v38 }
  0xa9   : > { %391 = vmatpush.msra.mxu0 %v341_v39  ;;  %882 = vmatpush.msra.mxu2 %v341_v39 }
  0xaa   : > { %v908_v42 = vpop.permute.xlu1 %907  ;;  %417 = vmatpush.msra.mxu1 %v342_v41  ;;  %885 = vmatpush.msra.mxu3 %v342_v41 }
  0xab   : > { %v910_v44 = vunpack.i.h.bf16 %v908_v42  ;;  %v909_v45 = vunpack.i.l.bf16 %v908_v42 }
  0xac   : > { %v354_v3 = vpop.permute.xlu0 %353 }
  0xad   : > { %v272_v47 = vsel %vm270_vm7, %v910_v44, %v909_v45  ;;  %v271_v48 = vsel %vm270_vm7, %v909_v45, %v910_v44 }
  0xae   : > { %v279_v50 = vsel %vm273_vm8, %v272_v47, 0.0  ;;  %v280_v52 = vsel %vm274_vm9, %v271_v48, 0.0 }
  0xaf   : > { %v323_v53 = vrot.slane %v279_v50, 4  ;;  %v324_v54 = vrot.slane %v280_v52, 4 }
  0xb1   : > { %v339_v55 = vsel %vm338_vm4, %v259_v49, %v323_v53  ;;  %v340_v56 = vsel %vm338_vm4, %v260_v51, %v324_v54 }
  0xb2   : > { %392 = vmatpush.msra.mxu0 %v339_v55  ;;  %883 = vmatpush.msra.mxu2 %v339_v55 }
  0xb3   : > { %418 = vmatpush.msra.mxu1 %v340_v56  ;;  %886 = vmatpush.msra.mxu3 %v340_v56 }
  0xb4   : > { %863 = vmatmul.msk.f32.vlgmr.msra.gmra.mxu0 %vm361_vm11, %v237_v57  ;;  %864 = vmatmul.msk.f32.vlgmr.msra.gmra.mxu2 %vm361_vm11, %v238_v58 }
  0xb5   : > { %867 = vmatmul.msk.f32.vlgmr.msra.gmra.mxu1 %vm361_vm11, %v237_v57  ;;  %868 = vmatmul.msk.f32.vlgmr.msra.gmra.mxu3 %vm361_vm11, %v238_v58 }
  0xbc   : > { %865 = vmatmul.msk.f32.gmra.mxu2 %vm361_vm11, %v239_v59 }
  0xbd   : > { %869 = vmatmul.msk.f32.gmra.mxu3 %vm361_vm11, %v239_v59 }
 0x131   : > { %v394_v61 = vpop.f32.mrf.mxu0 }
 0x132   : > { %v1031_v62 = vadd.f32 %v394_v61, %v349_v60  ;;  %v420_v63 = vpop.f32.mrf.mxu1 }
 0x133   : > { %v1033_v0 = vadd.f32 %v420_v63, %v349_v60 }
 0x134   : > { %v1036_v1 = vmul.f32 0.70710677, %v1031_v62 }
 0x135   : > { %v1039_v2 = vmul.f32 0.70710677, %v1033_v0 }
 0x136   : > { %v441_v4 = vmul.f32 %v1036_v1, %v1036_v1 }
 0x137   : > { %v481_v5 = vmul.f32 %v1039_v2, %v1039_v2  ;;  %v397_v6 = vpop.f32.mrf.mxu2 }
 0x138   : > { %v442_v7 = vmin.f32 %v441_v4, 16.0  ;;  %v1045_v8 = vadd.f32 %v397_v6, %v354_v3  ;;  %v423_v9 = vpop.f32.mrf.mxu3 }
 0x139   : > { %v482_v10 = vmin.f32 %v481_v5, 16.0  ;;  %v1047_v11 = vadd.f32 %v423_v9, %v354_v3 }
 0x13a   : > { %v443_v12 = vmul.f32 2.1237322e-06, %v442_v7  ;;  %v454_v15 = vmul.f32 3.8918573e-05, %v442_v7  ;;  %v1050_v18 = vmul.f32 0.70710677, %v1045_v8 }
 0x13b   : > { %v483_v16 = vmul.f32 2.1237322e-06, %v482_v10  ;;  %v494_v17 = vmul.f32 3.8918573e-05, %v482_v10  ;;  %v1055_v24 = vmul.f32 0.70710677, %v1047_v11 }
 0x13c   : > { %v444_v19 = vadd.f32 0.00028619796, %v443_v12  ;;  %v455_v20 = vadd.f32 0.001143296, %v454_v15  ;;  %v521_v23 = vmul.f32 %v1050_v18, %v1050_v18 }
 0x13d   : > { %v484_v21 = vadd.f32 0.00028619796, %v483_v16  ;;  %v495_v22 = vadd.f32 0.001143296, %v494_v17  ;;  %v561_v30 = vmul.f32 %v1055_v24, %v1055_v24 }
 0x13e   : > { %v445_v25 = vmul.f32 %v444_v19, %v442_v7  ;;  %v456_v26 = vmul.f32 %v455_v20, %v442_v7  ;;  %v1057_v29 = vmin.f32 %v521_v23, 16.0  ;;  %v359_v20 = vpop.permute.xlu1 %358 }
 0x13f   : > { %v485_v27 = vmul.f32 %v484_v21, %v482_v10  ;;  %v496_v28 = vmul.f32 %v495_v22, %v482_v10  ;;  %v1063_v39 = vmin.f32 %v561_v30, 16.0  ;;  %v400_v21 = vpop.f32.mrf.mxu2 }
 0x140   : > { %v446_v31 = vadd.f32 0.0036580483, %v445_v25  ;;  %v457_v32 = vadd.f32 0.014752088, %v456_v26  ;;  %v523_v35 = vmul.f32 2.1237322e-06, %v1057_v29 }
 0x141   : > { %v486_v33 = vadd.f32 0.0036580483, %v485_v27  ;;  %v497_v34 = vadd.f32 0.014752088, %v496_v28  ;;  %v534_v38 = vmul.f32 3.8918573e-05, %v1057_v29 }
 0x142   : > { %v447_v36 = vmul.f32 %v446_v31, %v442_v7  ;;  %v458_v37 = vmul.f32 %v457_v32, %v442_v7  ;;  %v524_v42 = vadd.f32 0.00028619796, %v523_v35  ;;  %v563_v49 = vmul.f32 2.1237322e-06, %v1063_v39  ;;  %v426_v31 = vpop.f32.mrf.mxu3 }
 0x143   : > { %v487_v40 = vmul.f32 %v486_v33, %v482_v10  ;;  %v498_v41 = vmul.f32 %v497_v34, %v482_v10  ;;  %v535_v45 = vadd.f32 0.001143296, %v534_v38  ;;  %v574_v53 = vmul.f32 3.8918573e-05, %v1063_v39 }
 0x144   : > { %v448_v43 = vadd.f32 0.05243302, %v447_v36  ;;  %v459_v44 = vadd.f32 0.112945676, %v458_v37  ;;  %v525_v48 = vmul.f32 %v524_v42, %v1057_v29  ;;  %v564_v57 = vadd.f32 0.00028619796, %v563_v49 }
 0x145   : > { %v488_v46 = vadd.f32 0.05243302, %v487_v40  ;;  %v499_v47 = vadd.f32 0.112945676, %v498_v41  ;;  %v536_v52 = vmul.f32 %v535_v45, %v1057_v29  ;;  %v575_v12 = vadd.f32 0.001143296, %v574_v53 }
 0x146   : > { %v449_v50 = vmul.f32 %v448_v43, %v442_v7  ;;  %v460_v51 = vmul.f32 %v459_v44, %v442_v7  ;;  %v526_v56 = vadd.f32 0.0036580483, %v525_v48  ;;  %v565_v4 = vmul.f32 %v564_v57, %v1063_v39 }
 0x147   : > { %v489_v54 = vmul.f32 %v488_v46, %v482_v10  ;;  %v500_v55 = vmul.f32 %v499_v47, %v482_v10  ;;  %v537_v60 = vadd.f32 0.014752088, %v536_v52  ;;  %v576_v27 = vmul.f32 %v575_v12, %v1063_v39 }
 0x148   : > { %v450_v58 = vadd.f32 0.18741608, %v449_v50  ;;  %v461_v59 = vadd.f32 0.4994258, %v460_v51  ;;  %v527_v3 = vmul.f32 %v526_v56, %v1057_v29  ;;  %v566_v19 = vadd.f32 0.0036580483, %v565_v4 }
 0x149   : > { %v490_v61 = vadd.f32 0.18741608, %v489_v54  ;;  %v501_v63 = vadd.f32 0.4994258, %v500_v55  ;;  %v538_v9 = vmul.f32 %v537_v60, %v1057_v29  ;;  %v1084_v32 = vmul.f32 0.5, %v1031_v62 }
 0x14a   : > { %v451_v5 = vmul.f32 %v450_v58, %v442_v7  ;;  %v462_v6 = vmul.f32 %v461_v59, %v442_v7  ;;  %v528_v17 = vadd.f32 0.05243302, %v527_v3  ;;  %v567_v26 = vmul.f32 %v566_v19, %v1063_v39 }
 0x14b   : > { %v491_v15 = vmul.f32 %v490_v61, %v482_v10  ;;  %v502_v16 = vmul.f32 %v501_v63, %v482_v10  ;;  %v539_v25 = vadd.f32 0.112945676, %v538_v9  ;;  %v1079_v7 = vadd.f32 %v400_v21, %v359_v20 }
 0x14c   : > { %v1072_v22 = vadd.f32 1.0, %v462_v6  ;;  %v452_v28 = vadd.f32 1.1283791, %v451_v5  ;;  %v529_v10 = vmul.f32 %v528_v17, %v1057_v29  ;;  %v1087_v33 = vmul.f32 0.5, %v1033_v0 }
 0x14d   : > { %v1074_v23 = vadd.f32 1.0, %v502_v16  ;;  %v492_v30 = vadd.f32 1.1283791, %v491_v15  ;;  %v540_v35 = vmul.f32 %v539_v25, %v1057_v29  ;;  %v568_v36 = vadd.f32 0.05243302, %v567_v26 }
 0x14e   : > { %919 = vrcp.f32 %v1072_v22  ;;  %v473_v34 = vand.u32 2147483647, %v1072_v22  ;;  %v577_v37 = vadd.f32 0.014752088, %v576_v27  ;;  %v453_v38 = vmul.f32 %v452_v28, %v1036_v1 }
 0x14f   : > { %921 = vrcp.f32 %v1074_v23  ;;  %v475_v40 = vand.u32 2147483648, %v1072_v22  ;;  %v1094_v41 = vmul.f32 0.70710677, %v1079_v7  ;;  %v1096_v42 = vadd.f32 %v426_v31, %v359_v20 }
 0x150   : > { %vm469_vm12 = vweird.f32 %v1072_v22  ;;  %v493_v62 = vmul.f32 %v492_v30, %v1039_v2  ;;  %v530_v0 = vadd.f32 0.18741608, %v529_v10  ;;  %v541_v43 = vadd.f32 0.4994258, %v540_v35 }
 0x151   : > { %v578_v44 = vmul.f32 %v577_v37, %v1063_v39  ;;  %vm509_vm13 = vweird.f32 %v1074_v23  ;;  %v513_v1 = vand.u32 2147483647, %v1074_v23  ;;  %v569_v46 = vmul.f32 %v568_v36, %v1063_v39 }
 0x152   : > { %v601_v47 = vmul.f32 %v1094_v41, %v1094_v41  ;;  %vm1107_vm14 = vcmp.eq.f32.partialorder %v473_v34, 8.507059e+37  ;;  %v515_v50 = vand.u32 2147483648, %v1074_v23  ;;  %v542_v51 = vmul.f32 %v541_v43, %v1057_v29 }
 0x153   : > { %v476_v52 = vor.u32 1.1754944e-38, %v475_v40  ;;  %v579_v54 = vadd.f32 0.112945676, %v578_v44  ;;  %v1115_v55 = vmul.f32 0.70710677, %v1096_v42  ;;  %v531_v57 = vmul.f32 %v530_v0, %v1057_v29 }
 0x154   : > { %v920_v45 = vpop.eup %919  ;;  %v1118_v58 = vadd.f32 1.0, %v542_v51  ;;  %v1120_v59 = vmin.f32 %v601_v47, 16.0  ;;  %vm1123_vm15 = vcmp.eq.f32.partialorder %v513_v1, 8.507059e+37  ;;  %v570_v63 = vadd.f32 0.18741608, %v569_v46 }
 0x155   : > { %v922_v48 = vpop.eup %921  ;;  %v465_v49 = vmul.f32 %v920_v45, %v1072_v22  ;;  %v580_v3 = vmul.f32 %v579_v54, %v1063_v39  ;;  %vm470_vm0 = vweird.f32 %v920_v45  ;;  %v516_v5 = vor.u32 1.1754944e-38, %v515_v50 }
 0x156   : > { %v505_v53 = vmul.f32 %v922_v48, %v1074_v23  ;;  %923 = vrcp.f32 %v1118_v58  ;;  %vm510_vm1 = vweird.f32 %v922_v48  ;;  %v641_v9 = vmul.f32 %v1115_v55, %v1115_v55  ;;  %vm471_vm2 = vmor %vm469_vm12, %vm470_vm0 }
 0x157   : > { %v466_v56 = vsub.f32 1.0, %v465_v49  ;;  %v581_v29 = vadd.f32 0.4994258, %v580_v3  ;;  %v532_v15 = vadd.f32 1.1283791, %v531_v57  ;;  %v571_v21 = vmul.f32 %v570_v63, %v1063_v39  ;;  %vm511_vm3 = vmor %vm509_vm13, %vm510_vm1 }
 0x158   : > { %v506_v60 = vsub.f32 1.0, %v505_v53  ;;  %v603_v16 = vmul.f32 2.1237322e-06, %v1120_v59  ;;  %v614_v17 = vmul.f32 3.8918573e-05, %v1120_v59  ;;  %v555_v27 = vand.u32 2147483648, %v1118_v58 }
 0x159   : > { %v467_v4 = vmul.f32 %v920_v45, %v466_v56  ;;  %v553_v20 = vand.u32 2147483647, %v1118_v58  ;;  %v582_v25 = vmul.f32 %v581_v29, %v1063_v39  ;;  %v1148_v34 = vmin.f32 %v641_v9, 16.0 }
 0x15a   : > { %v507_v6 = vmul.f32 %v922_v48, %v506_v60  ;;  %v604_v28 = vadd.f32 0.00028619796, %v603_v16  ;;  %v615_v30 = vadd.f32 0.001143296, %v614_v17  ;;  %v533_v0 = vmul.f32 %v532_v15, %v1050_v18 }
 0x15b   : > { %v468_v12 = vadd.f32 %v920_v45, %v467_v4  ;;  %v1146_v31 = vadd.f32 1.0, %v582_v25  ;;  %vm549_vm4 = vweird.f32 %v1118_v58  ;;  %vm1158_vm5 = vcmp.eq.f32.partialorder %v553_v20, 8.507059e+37 }
 0x15c   : > { %v508_v19 = vadd.f32 %v922_v48, %v507_v6  ;;  %v924_v39 = vpop.eup %923  ;;  %v605_v36 = vmul.f32 %v604_v28, %v1120_v59  ;;  %v616_v37 = vmul.f32 %v615_v30, %v1120_v59  ;;  %v643_v18 = vmul.f32 2.1237322e-06, %v1148_v34 }
 0x15d   : > { %v472_v26 = vsel %vm471_vm2, %v920_v45, %v468_v12  ;;  %v545_v43 = vmul.f32 %v924_v39, %v1118_v58  ;;  %925 = vrcp.f32 %v1146_v31  ;;  %vm550_vm6 = vweird.f32 %v924_v39 }
 0x15e   : > { %v477_v22 = vsel %vm1107_vm14, %v476_v52, %v472_v26  ;;  %v512_v10 = vsel %vm511_vm3, %v922_v48, %v508_v19  ;;  %v606_v45 = vadd.f32 0.0036580483, %v605_v36  ;;  %v617_v46 = vadd.f32 0.014752088, %v616_v37  ;;  %vm551_vm7 = vmor %vm549_vm4, %vm550_vm6 }
 0x15f   : > { %v478_v35 = vmul.f32 %v477_v22, %v453_v38  ;;  %v517_v23 = vsel %vm1123_vm15, %v516_v5, %v512_v10  ;;  %v572_v38 = vadd.f32 1.1283791, %v571_v21  ;;  %v546_v1 = vsub.f32 1.0, %v545_v43 }
 0x160   : > { %v518_v40 = vmul.f32 %v517_v23, %v493_v62  ;;  %v556_v47 = vor.u32 1.1754944e-38, %v555_v27  ;;  %v607_v48 = vmul.f32 %v606_v45, %v1120_v59  ;;  %v654_v49 = vmul.f32 3.8918573e-05, %v1148_v34 }
 0x161   : > { %v870_v62 = vclamps-f32 %v478_v35, 1.0  ;;  %v547_v2 = vmul.f32 %v924_v39, %v546_v1  ;;  %v618_v50 = vmul.f32 %v617_v46, %v1120_v59  ;;  %v644_v51 = vadd.f32 0.00028619796, %v643_v18 }
 0x162   : > { %v871_v52 = vclamps-f32 %v518_v40, 1.0  ;;  %v573_v53 = vmul.f32 %v572_v38, %v1055_v24  ;;  %v595_v54 = vand.u32 2147483648, %v1146_v31  ;;  %v655_v56 = vadd.f32 0.001143296, %v654_v49 }
 0x163   : > { %v681_v57 = vadd.f32 1.0, %v870_v62  ;;  %v926_v60 = vpop.eup %925  ;;  %v548_v61 = vadd.f32 %v924_v39, %v547_v2  ;;  %v619_v63 = vadd.f32 0.112945676, %v618_v50  ;;  %v645_v3 = vmul.f32 %v644_v51, %v1148_v34 }
 0x164   : > { %v682_v4 = vadd.f32 1.0, %v871_v52  ;;  %v585_v5 = vmul.f32 %v926_v60, %v1146_v31  ;;  %vm589_vm8 = vweird.f32 %v1146_v31  ;;  %v608_v24 = vadd.f32 0.05243302, %v607_v48 }
 0x165   : > { %v656_v6 = vmul.f32 %v655_v56, %v1148_v34  ;;  %v552_v29 = vsel %vm551_vm7, %v924_v39, %v548_v61  ;;  %v620_v9 = vmul.f32 %v619_v63, %v1120_v59  ;;  %v687_v12 = vmul.f32 %v681_v57, %v1084_v32 }
 0x166   : > { %v1189_v58 = vstv %s877_s16  ;;  %v586_v15 = vsub.f32 1.0, %v585_v5  ;;  %v593_v16 = vand.u32 2147483647, %v1146_v31  ;;  %v596_v17 = vor.u32 1.1754944e-38, %v595_v54 }
 0x167   : > { %v657_v19 = vadd.f32 0.014752088, %v656_v6  ;;  %v557_v20 = vsel %vm1158_vm5, %v556_v47, %v552_v29  ;;  %v621_v21 = vadd.f32 0.4994258, %v620_v9  ;;  %v646_v25 = vadd.f32 0.0036580483, %v645_v3  ;;  %693 = vst [vmem:[%s1184_s20] sm:$0xff] %v687_v12 }
 0x168   : > { %v688_v26 = vmul.f32 %v682_v4, %v1087_v33  ;;  %v587_v27 = vmul.f32 %v926_v60, %v586_v15  ;;  %vm590_vm9 = vweird.f32 %v926_v60  ;;  %vm705_vm10 = vcmp.lt.s32.totalorder %v987_v13, %v1189_v58 }
 0x169   : > { %v658_v32 = vmul.f32 %v657_v19, %v1148_v34  ;;  %v609_v28 = vmul.f32 %v608_v24, %v1120_v59  ;;  %v622_v30 = vmul.f32 %v621_v21, %v1120_v59  ;;  %vm706_vm11 = vcmp.lt.s32.totalorder %v990_v14, %v1189_v58  ;;  %vm591_vm12 = vmor %vm589_vm8, %vm590_vm9 }
 0x16a   : > { %694 = vst [vmem:[%s1184_s20 + $0x8] sm:$0xff] %v688_v26  ;;  %v711_v33 = vsel %vm705_vm10, %v687_v12, 0.0  ;;  %v558_v22 = vmul.f32 %v557_v20, %v533_v0  ;;  %v588_v10 = vadd.f32 %v926_v60, %v587_v27  ;;  %v712_v35 = vsel %vm706_vm11, %v688_v26, 0.0 }
 0x16b   : > { %v659_v39 = vadd.f32 0.112945676, %v658_v32  ;;  %v623_v23 = vadd.f32 1.0, %v622_v30  ;;  %v647_v36 = vmul.f32 %v646_v25, %v1148_v34  ;;  %v717_v37 = vadd.f32 %v712_v35, %v711_v33 }
 0x16c   : > { %v726_v40 = vmul.f32 %v711_v33, %v711_v33  ;;  %v592_v43 = vsel %vm591_vm12, %v926_v60, %v588_v10  ;;  %vm594_vm13 = vcmp.eq.f32.partialorder %v593_v16, 8.507059e+37  ;;  %v727_v38 = vmul.f32 %v712_v35, %v712_v35 }
 0x16d   : > { %v660_v44 = vmul.f32 %v659_v39, %v1148_v34  ;;  %v597_v0 = vsel %vm594_vm13, %v596_v17, %v592_v43  ;;  %927 = vrcp.f32 %v623_v23  ;;  %718 = vadd.xlane.f32.xlu2 %v717_v37  ;;  %v610_v1 = vadd.f32 0.18741608, %v609_v28 }
 0x16e   : > { %v598_v45 = vmul.f32 %v597_v0, %v573_v53  ;;  %v648_v18 = vadd.f32 0.05243302, %v647_v36  ;;  %v732_v62 = vadd.f32 %v727_v38, %v726_v40  ;;  %v872_v31 = vclamps-f32 %v558_v22, 1.0 }
 0x16f   : > { %v661_v46 = vadd.f32 0.4994258, %v660_v44  ;;  %v431_v49 = vmul.f32 0.5, %v1045_v8  ;;  %v611_v50 = vmul.f32 %v610_v1, %v1120_v59  ;;  %v432_v53 = vmul.f32 0.5, %v1047_v11 }
 0x170   : > { %v873_v48 = vclamps-f32 %v598_v45, 1.0  ;;  %733 = vadd.xlane.f32.xlu0 %v732_v62  ;;  %v683_v2 = vadd.f32 1.0, %v872_v31  ;;  %v649_v56 = vmul.f32 %v648_v18, %v1148_v34  ;;  %v633_v8 = vand.u32 2147483647, %v623_v23 }
 0x171   : > { %v662_v47 = vmul.f32 %v661_v46, %v1148_v34  ;;  %v612_v63 = vadd.f32 1.1283791, %v611_v50  ;;  %v635_v4 = vand.u32 2147483648, %v623_v23  ;;  %vm629_vm15 = vweird.f32 %v623_v23 }
 0x172   : > { %v684_v52 = vadd.f32 1.0, %v873_v48  ;;  %v689_v57 = vmul.f32 %v683_v2, %v431_v49  ;;  %v650_v5 = vadd.f32 0.18741608, %v649_v56  ;;  %vm634_vm1 = vcmp.eq.f32.partialorder %v633_v8, 8.507059e+37 }
 0x173   : > { %v663_v51 = vadd.f32 1.0, %v662_v47  ;;  %v928_v54 = vpop.eup %927  ;;  %v636_v17 = vor.u32 1.1754944e-38, %v635_v4  ;;  %v613_v21 = vmul.f32 %v612_v63, %v1094_v41  ;;  %v434_v38 = vmul.f32 0.5, %v1096_v42 }
 0x174   : > { %v625_v60 = vmul.f32 %v928_v54, %v623_v23  ;;  %v690_v61 = vmul.f32 %v684_v52, %v432_v53  ;;  %695 = vst [vmem:[%s1184_s20 + $0x10] sm:$0xff] %v689_v57  ;;  %v713_v59 = vsel %vm705_vm10, %v689_v57, 0.0  ;;  %vm630_vm14 = vweird.f32 %v928_v54 }
 0x175   : > { %929 = vrcp.f32 %v663_v51  ;;  %v728_v24 = vmul.f32 %v713_v59, %v713_v59  ;;  %vm631_vm0 = vmor %vm629_vm15, %vm630_vm14  ;;  %v651_v19 = vmul.f32 %v650_v5, %v1148_v34  ;;  %v675_v28 = vand.u32 2147483648, %v663_v51 }
 0x176   : > { %v626_v3 = vsub.f32 1.0, %v625_v60  ;;  %696 = vst [vmem:[%s1184_s20 + $0x18] sm:$0xff] %v690_v61  ;;  %v714_v11 = vsel %vm706_vm11, %v690_v61, 0.0  ;;  %v673_v22 = vand.u32 2147483647, %v663_v51  ;;  %vm669_vm3 = vweird.f32 %v663_v51 }
 0x177   : > { %v720_v29 = vadd.f32 %v714_v11, %v713_v59  ;;  %v729_v9 = vmul.f32 %v714_v11, %v714_v11  ;;  %v652_v30 = vadd.f32 1.1283791, %v651_v19  ;;  %v433_v34 = vmul.f32 0.5, %v1079_v7 }
 0x178   : > { %v627_v6 = vmul.f32 %v928_v54, %v626_v3  ;;  %v676_v41 = vor.u32 1.1754944e-38, %v675_v28  ;;  %vm674_vm5 = vcmp.eq.f32.partialorder %v673_v22, 8.507059e+37  ;;  %v745_v47 = vadd.s32 4294967288, %v987_v13 }
 0x179   : > { %721 = vadd.xlane.f32.xlu1 %v720_v29  ;;  %v735_v16 = vadd.f32 %v729_v9, %v728_v24  ;;  %v653_v23 = vmul.f32 %v652_v30, %v1115_v55  ;;  %v749_v49 = vadd.s32 4294967280, %v987_v13  ;;  %vm747_vm6 = vcmask 130112  }
 0x17a   : > { %v628_v15 = vadd.f32 %v928_v54, %v627_v6  ;;  %vm751_vm7 = vcmask 195712   ;;  %vm763_vm8 = vcmask 1040384   ;;  %vm765_vm9 = vcmask 189440  }
 0x17b   : > { %v930_v12 = vpop.eup %929  ;;  %736 = vadd.xlane.f32.xlu2 %v735_v16 }
 0x17c   : > { %v665_v20 = vmul.f32 %v930_v12, %v663_v51  ;;  %v632_v25 = vsel %vm631_vm0, %v928_v54, %v628_v15  ;;  %vm670_vm2 = vweird.f32 %v930_v12 }
 0x17d   : > { %v637_v26 = vsel %vm634_vm1, %v636_v17, %v632_v25  ;;  %vm671_vm4 = vmor %vm669_vm3, %vm670_vm2 }
 0x17e   : > { %v666_v27 = vsub.f32 1.0, %v665_v20  ;;  %v638_v32 = vmul.f32 %v637_v26, %v613_v21 }
 0x180   : > { %v667_v33 = vmul.f32 %v930_v12, %v666_v27  ;;  %v874_v10 = vclamps-f32 %v638_v32, 1.0 }
 0x182   : > { %v668_v39 = vadd.f32 %v930_v12, %v667_v33  ;;  %v685_v35 = vadd.f32 1.0, %v874_v10 }
 0x184   : > { %v672_v36 = vsel %vm671_vm4, %v930_v12, %v668_v39  ;;  %v691_v37 = vmul.f32 %v685_v35, %v433_v34 }
 0x185   : > { %v677_v40 = vsel %vm674_vm5, %v676_v41, %v672_v36 }
 0x186   : > { %v678_v43 = vmul.f32 %v677_v40, %v653_v23  ;;  %697 = vst [vmem:[%s1184_s20 + $0x20] sm:$0xff] %v691_v37  ;;  %v715_v7 = vsel %vm705_vm10, %v691_v37, 0.0 }
 0x187   : > { %v730_v1 = vmul.f32 %v715_v7, %v715_v7 }
 0x188   : > { %v875_v44 = vclamps-f32 %v678_v43, 1.0 }
 0x18a   : > { %v686_v0 = vadd.f32 1.0, %v875_v44 }
 0x18c   : > { %v692_v45 = vmul.f32 %v686_v0, %v434_v38 }
 0x18e   : > { %698 = vst [vmem:[%s1184_s20 + $0x28] sm:$0xff] %v692_v45  ;;  %v716_v55 = vsel %vm706_vm11, %v692_v45, 0.0 }
 0x18f   : > { %v731_v46 = vmul.f32 %v716_v55, %v716_v55  ;;  %v723_v18 = vadd.f32 %v716_v55, %v715_v7 }
 0x191   : > { %v738_v62 = vadd.f32 %v731_v46, %v730_v1  ;;  %724 = vadd.xlane.f32.xlu2 %v723_v18 }
 0x193   : > { %739 = vadd.xlane.f32.xlu1 %v738_v62 }
 0x1e0   : > { %v719_v31 = vpop.xlane.xlu2 %718 }
 0x1e1   : > { %v744_v51 = vperm.slane %v719_v31, %v987_v13 }
 0x1e3   : > { %v734_v50 = vpop.xlane.xlu0 %733 }
 0x1e4   : > { %v757_v54 = vperm.slane %v734_v50, %v987_v13 }
 0x1ec   : > { %v722_v48 = vpop.xlane.xlu1 %721 }
 0x1ed   : > { %v746_v2 = vperm.slane %v722_v48, %v745_v47 }
 0x1ee   : > { %v737_v42 = vpop.xlane.xlu2 %736 }
 0x1ef   : > { %v758_v14 = vperm.slane %v737_v42, %v745_v47  ;;  %v748_v53 = vsel %vm747_vm6, %v746_v2, %v744_v51 }
 0x1f1   : > { %v759_v61 = vsel %vm747_vm6, %v758_v14, %v757_v54 }
 0x204   : > { %v725_v58 = vpop.xlane.xlu2 %724 }
 0x205   : > { %v750_v52 = vperm.slane %v725_v58, %v749_v49 }
 0x206   : > { %v740_v56 = vpop.xlane.xlu1 %739 }
 0x207   : > { %v760_v57 = vperm.slane %v740_v56, %v749_v49  ;;  %v752_v60 = vsel %vm751_vm7, %v750_v52, %v748_v53 }
 0x209   : > { %v761_v63 = vsel %vm751_vm7, %v760_v57, %v759_v61 }
 0x20a   : > { %v764_v3 = vsel %vm763_vm8, %v752_v60, %v761_v63 }
 0x20b   : > { %766 = vst.msk [vmem:[%s208_s24] sm:$0x3] %vm765_vm9, %v764_v3 }
 0x20c PF: > { %s15_s15 = sadd.s32 1, %s937_s15  }
 0x20d   : > { %p12_p5 = scmp.ge.s32.totalorder %s15_s15, 4  }
 0x20f   :  { %14 = sbr.rel (!%p12_p5) target bundleno = 1 (0x1), region = 74 }

</bundles_post_ra>
